<compile_context>
chip_gen: v5e
topology: v5e:2x2
jax: 0.10.0
libtpu: 0.0.40
codegen_flags: <defaults>
</compile_context>

<pallas_src>
import jax
import jax.numpy as jnp
from jax.experimental import pallas as pl
from jax.experimental.pallas import tpu as pltpu


def _round_up(v, m):
    return (v + m - 1) // m * m


def _pick_tile(hw, t_max, lanes=128):
    """Largest multiple-of-128 tile <= t_max that divides hw (=> no padding).

    Falls back to a padded tile when no such divisor exists."""
    cap = min(t_max, _round_up(hw, lanes))
    cap -= cap % lanes
    cap = max(cap, lanes)
    for cand in range(cap, 0, -lanes):
        if hw % cand == 0:
            return cand
    return cap  # pad path


def _deconv_bn_relu_kernel(x_ref, w_ref, shift_ref, o_ref):
    # x_ref     : (1, Cin, THW)   input dtype (f32 here) — one batch element
    # w_ref     : (4*Cout, Cin)   bf16  BN-scale-folded transposed-conv weight
    # shift_ref : (4*Cout, 1)     f32   fused conv-bias + BN shift
    # o_ref     : (1, 4*Cout, THW)      lane-dense output tile
    x = x_ref[0].astype(w_ref.dtype)          # in-kernel cast: VPU slack, no HBM cost
    y = jnp.dot(w_ref[...], x, preferred_element_type=jnp.float32)   # MXU
    y = y + shift_ref[...]                    # per-channel shift, broadcast on lanes
    o_ref[0] = jnp.maximum(y, 0.0).astype(o_ref.dtype)


def deconv_forward(x, weight, bias, gamma, beta, run_mean, run_var,
                   *, eps=1e-5, t_hw=1024, compute_dtype=jnp.bfloat16):
    """x: [N, Cin, H, W] (NCHW, like PyTorch). Returns [N, Cout, 2H, 2W]."""
    N, Cin, H, W = x.shape
    Cout = weight.shape[1]
    K = 2                       # kernel_size == stride == 2
    Cout4 = K * K * Cout
    HW = H * W

    # ---- constant folding (trace-time, one-off on tiny per-channel tensors) ----
    # BN(eval): y = (conv + bias) * a + b,  a = gamma/sqrt(var+eps), b = beta - mean*a
    a = gamma / jnp.sqrt(run_var + eps)
    b = beta - run_mean * a
    # weight [Cin, Cout, kh, kw] -> [(co, kh, kw), Cin]; fold BN scale in.
    w_t = jnp.transpose(weight, (1, 2, 3, 0)).reshape(Cout4, Cin)
    w_t = (w_t * jnp.repeat(a, K * K)[:, None]).astype(compute_dtype)
    # combined shift: bias*a + b, replicated per (kh, kw)
    shift = jnp.repeat(bias * a + b, K * K).reshape(Cout4, 1).astype(jnp.float32)

    # ---- input: NCHW -> [N, Cin, H*W] is a pure view; dtype untouched ----
    x3 = x.reshape(N, Cin, HW)

    # ---- lane-dense tiling of the spatial axis (multiple of 128) ----
    t = _pick_tile(HW, t_hw)
    HWp = _round_up(HW, t)
    if HWp != HW:
        x3 = jnp.pad(x3, ((0, 0), (0, 0), (0, HWp - HW)))

    y = pl.pallas_call(
        _deconv_bn_relu_kernel,
        out_shape=jax.ShapeDtypeStruct((N, Cout4, HWp), x.dtype),
        grid_spec=pltpu.PrefetchScalarGridSpec(
            num_scalar_prefetch=0,
            grid=(N, HWp // t),
            in_specs=[
                pl.BlockSpec((1, Cin, t), lambda n, j: (n, 0, j)),
                pl.BlockSpec((Cout4, Cin), lambda n, j: (0, 0)),
                pl.BlockSpec((Cout4, 1), lambda n, j: (0, 0)),
            ],
            out_specs=pl.BlockSpec((1, Cout4, t), lambda n, j: (n, 0, j)),
        ),
        compiler_params=pltpu.CompilerParams(
            dimension_semantics=("parallel", "parallel")),
    )(x3, w_t, shift)

    if HWp != HW:
        y = y[:, :, :HW]

    # ---- scatter 2x2 patches back to NCHW (only remaining shuffle) ----
    # y: [N, (co, kh, kw), H*W] -> [N, Cout, 2H, 2W]
    y = y.reshape(N, Cout, K, K, H, W)
    y = jnp.transpose(y, (0, 1, 4, 2, 5, 3))        # [N, Cout, H, kh, W, kw]
    return y.reshape(N, Cout, K * H, K * W)


def _reference(x, weight, bias, gamma, beta, run_mean, run_var, eps=1e-5):
    """Pure-JAX f32 reference with identical semantics (for verification)."""
    N, Cin, H, W = x.shape
    Cout = weight.shape[1]
    # out[n, co, 2h+kh, 2w+kw] = sum_ci x[n,ci,h,w] * W[ci,co,kh,kw] + bias[co]
    y = jnp.einsum("nchw,cokl->nohklw", x, weight)
    y = jnp.transpose(y, (0, 1, 2, 3, 5, 4))        # [N, Cout, H, kh, W, kw]
    y = y.reshape(N, Cout, 2 * H, 2 * W) + bias[None, :, None, None]
    a = gamma / jnp.sqrt(run_var + eps)
    b = beta - run_mean * a
    y = y * a[None, :, None, None] + b[None, :, None, None]
    return jnp.maximum(y, 0.0)


if __name__ == "__main__":
    key = jax.random.PRNGKey(0)
    k_x, k_w, k_b, k_g, k_be, k_m, k_v = jax.random.split(key, 7)

    N, Cin, H, W = 2, 4, 16, 16
    Cout, K = 8, 2

    x = jax.random.normal(k_x, (N, Cin, H, W), jnp.float32)
    weight = jax.random.normal(k_w, (Cin, Cout, K, K), jnp.float32) * 0.2
    bias = jax.random.normal(k_b, (Cout,), jnp.float32) * 0.1
    gamma = 1.0 + 0.1 * jax.random.normal(k_g, (Cout,), jnp.float32)
    beta = 0.1 * jax.random.normal(k_be, (Cout,), jnp.float32)
    run_mean = 0.1 * jax.random.normal(k_m, (Cout,), jnp.float32)
    run_var = 1.0 + 0.1 * jax.random.uniform(k_v, (Cout,), jnp.float32)

    out = deconv_forward(x, weight, bias, gamma, beta, run_mean, run_var)
    out = jax.block_until_ready(out)

    ref = _reference(x, weight, bias, gamma, beta, run_mean, run_var)
    assert out.shape == (N, Cout, 2 * H, 2 * W), out.shape
    # bf16 matmul operands (f32 accumulation / epilogue) => slightly looser tol.
    assert jnp.allclose(out, ref, atol=2e-2, rtol=2e-2), "mismatch vs reference"

    print("KERNEL_OK")
</pallas_src>

<mosaic_0001>
module attributes {stable_mosaic.version = 11 : i64} {
  func.func @_deconv_bn_relu_kernel(%arg0: i32, %arg1: i32, %arg2: memref<1x4x256xf32, #tpu.memory_space<vmem>>, %arg3: memref<32x4xbf16, #tpu.memory_space<vmem>>, %arg4: memref<32x1xf32, #tpu.memory_space<vmem>>, %arg5: memref<1x32x256xf32, #tpu.memory_space<vmem>>) attributes {dimension_semantics = [#tpu.dimension_semantics<parallel>, #tpu.dimension_semantics<parallel>], iteration_bounds = array<i64: 2, 1>, scalar_prefetch = 0 : i64, scratch_operands = 0 : i64, tpu.core_type = #tpu.core_type<tc>, window_params = [{transform_indices = @transform_0, window_bounds = array<i64: 1, 4, 256>}, {pipeline_mode = #tpu.pipeline_mode<synchronous>, transform_indices = @transform_1, window_bounds = array<i64: 32, 4>}, {pipeline_mode = #tpu.pipeline_mode<synchronous>, transform_indices = @transform_2, window_bounds = array<i64: 32, 1>}, {transform_indices = @transform_3, window_bounds = array<i64: 1, 32, 256>}]} {
    %c0 = arith.constant 0 : index
    %c0_0 = arith.constant 0 : index
    %c0_1 = arith.constant 0 : index
    %0 = vector.load %arg2[%c0, %c0_0, %c0_1] : memref<1x4x256xf32, #tpu.memory_space<vmem>>, vector<1x4x256xf32>
    %1 = vector.shape_cast %0 : vector<1x4x256xf32> to vector<4x256xf32>
    %2 = arith.truncf %1 : vector<4x256xf32> to vector<4x256xbf16>
    %c0_2 = arith.constant 0 : index
    %c0_3 = arith.constant 0 : index
    %3 = vector.load %arg3[%c0_2, %c0_3] : memref<32x4xbf16, #tpu.memory_space<vmem>>, vector<32x4xbf16>
    %cst = arith.constant dense<0.000000e+00> : vector<32x256xf32>
    %4 = tpu.matmul %3, %2, %cst {dimension_numbers = #tpu.dot_dimension_numbers<[1], [0], [0], [1], [0, 0, 1, 1], [], []>} : vector<32x4xbf16>, vector<4x256xbf16>, vector<32x256xf32> -> vector<32x256xf32>
    %c0_4 = arith.constant 0 : index
    %c0_5 = arith.constant 0 : index
    %5 = vector.load %arg4[%c0_4, %c0_5] : memref<32x1xf32, #tpu.memory_space<vmem>>, vector<32x1xf32>
    %6 = vector.broadcast %5 : vector<32x1xf32> to vector<32x256xf32>
    %7 = arith.addf %4, %6 : vector<32x256xf32>
    %cst_6 = arith.constant 0.000000e+00 : f32
    %8 = vector.broadcast %cst_6 : f32 to vector<32x256xf32>
    %9 = arith.maximumf %7, %8 : vector<32x256xf32>
    %c0_7 = arith.constant 0 : index
    %c0_8 = arith.constant 0 : index
    %c0_9 = arith.constant 0 : index
    %10 = vector.load %arg5[%c0_7, %c0_8, %c0_9] : memref<1x32x256xf32, #tpu.memory_space<vmem>>, vector<1x32x256xf32>
    %11 = vector.shape_cast %10 : vector<1x32x256xf32> to vector<32x256xf32>
    %12 = vector.shape_cast %9 : vector<32x256xf32> to vector<1x32x256xf32>
    tpu.vector_store %arg5[%c0_7, %c0_8, %c0_9], %12 {strides = array<i32>} : memref<1x32x256xf32, #tpu.memory_space<vmem>>, vector<1x32x256xf32>,
    return
  }
  func.func @transform_0(%arg0: i32, %arg1: i32) -> (i32, i32, i32) {
    %c0_i32 = arith.constant 0 : i32
    %c0_i32_0 = arith.constant 0 : i32
    return %arg0, %c0_i32, %arg1 : i32, i32, i32
  }
  func.func @transform_1(%arg0: i32, %arg1: i32) -> (i32, i32) {
    %c0_i32 = arith.constant 0 : i32
    %c0_i32_0 = arith.constant 0 : i32
    %c0_i32_1 = arith.constant 0 : i32
    return %c0_i32, %c0_i32_0 : i32, i32
  }
  func.func @transform_2(%arg0: i32, %arg1: i32) -> (i32, i32) {
    %c0_i32 = arith.constant 0 : i32
    %c0_i32_0 = arith.constant 0 : i32
    %c0_i32_1 = arith.constant 0 : i32
    return %c0_i32, %c0_i32_0 : i32, i32
  }
  func.func @transform_3(%arg0: i32, %arg1: i32) -> (i32, i32, i32) {
    %c0_i32 = arith.constant 0 : i32
    %c0_i32_0 = arith.constant 0 : i32
    return %arg0, %c0_i32, %arg1 : i32, i32, i32
  }
}

</mosaic_0001>

<bundles_post_ra>
// kernel: tpu_custom_call.1
= control target key start
LH: loop header
LB: loop body
LE: loop exit
PB: predicated region body
PF: predicated region fallthrough
CT: control target
= control target key end

     0   :  { %8 = vsyncpa [#allocation3], 0  ;;  %s737_s0 = inlined_call_operand.vmem [shape: f32[2,4,256], index: 0, kind: input, shape index: {}]   ;;  %s738_s1 = inlined_call_operand.vmem [shape: bf16[32,4], index: 1, kind: input, shape index: {}]   ;;  %s739_s2 = inlined_call_operand.vmem [shape: f32[32,1], index: 2, kind: input, shape index: {}]   ;;  %s740_s3 = inlined_call_operand.hbm [shape: f32[2,32,256], index: 3, kind: output, shape index: {}]  }
   0x1   :  { %10 = vsyncpa [#allocation3 + $0x1], 0  ;;  %s607_s12 = smov 0   ;;  %s609_s13 = smov 0  }
   0x2   :  { %s611_s14 = smov 0   ;;  %s613_s15 = smov 0  }
   0x3   :  { %s615_s16 = smov 0   ;;  %s617_s17 = smov 0  }
   0x4 LB: > { %s413_s18 = sadd.s32 4294967295, %s582_s17   ;;  %s414_s19 = sadd.s32 4294967294, %s582_s17   ;;  %s582_s17 = sphi %s617_s17, %s16_s17   ;;  %s578_s16 = sphi %s615_s16, %s747_s16   ;;  %s574_s15 = sphi %s613_s15, %s746_s15   ;;  %s570_s14 = sphi %s611_s14, %s745_s14   ;;  %s566_s13 = sphi %s609_s13, %s744_s13   ;;  %s562_s12 = sphi %s607_s12, %s743_s12  }
   0x5   : > { %s28_s20 = sadd.s32 1, %s578_s16  ;;  %s107_s21 = sadd.s32 1, %s570_s14 }
   0x6   : > { %p30_p0 = scmp.ge.s32.totalorder %s28_s20, 2  ;;  %p117_p1 = scmp.ne.s32.totalorder %s570_s14, %s566_s13 }
   0x7   : > { %p118_p2 = scmp.eq.s32.totalorder %s413_s18, 1  ;;  %p123_p3 = scmp.ne.s32.totalorder %s566_s13, %s562_s12 }
   0x8   : > { %s749_s20 = smov (%p30_p0, %s28_s20), 0  ;;  %p124_p5 = scmp.eq.s32.totalorder %s414_s19, 1 }
   0x9   : > { %p647_p4 = por %p118_p2, %p117_p1  ;;  %s102_s23 = ssub.s32 %s578_s16, %s749_s20 }
   0xa   : > { %p417_p6 = scmp.ge.s32.totalorder %s582_s17, 1  ;;  %p105_p7 = scmp.eq.s32.totalorder %s102_s23, 0 }
   0xb   : > { %p654_p8 = por %p124_p5, %p123_p3  ;;  %p161_p9 = scmp.lt.s32.totalorder %s582_s17, 3 }
   0xc   : > { %s660_s25 = scalar_select %p105_p7, %s570_s14, %s107_s21  }
   0xd   : > { %p162_p10 = pnand %p417_p6, %p161_p9 }
   0xe   : > { %p190_p11 = scmp.lt.s32.totalorder (!%p162_p10), %s574_s15, 1  ;;  %s186_s26 = sand.u32 (!%p162_p10), 1, %s566_s13  }
   0xf   : > { %165 = sbr.rel (%p162_p10) target bundleno = 188 (0xbc), region = 32  ;;  %s418_s27 = sshll.u32 (!%p162_p10), %s186_s26, 6 }
  0x10   : > { %s688_s28 = scalar_lea.vmem (!%p162_p10), [#allocation2], %s418_s27  ;;  %s441_s29 = sshll.u32 (!%p162_p10), %s574_s15, 6 }
  0x11   : > { %s330_s5 = scalar_lea.hbm (!%p162_p10), %s740_s3, %s441_s29  ;;  %s524_s18 = scalar_lea.hbm (!%p162_p10), %s740_s3, 128 }
  0x12   : > { %s333_s6 = sshll.u32 (!%p162_p10), %s330_s5, 4  ;;  %s334_s6 = int_to_ptr.hbm [resolvable:$true] %s333_s6 }
  0x13   : > { %s518_s8 = sshra.s32 (!%p162_p10), %s334_s6, 4  ;;  %s519_s8 = int_to_ptr.hbm [resolvable:$true] %s518_s8 }
  0x14   : > { %v584_v0 = vmov 0   ;;  %v216_v1 = vld [vmem:[%s739_s2 + $0x10] sm:$0xff]  ;;  %v214_v2 = vld [vmem:[%s739_s2] sm:$0xff]  ;;  %s191_s30 = scalar_select %p190_p11, %s574_s15, 1  ;;  %v217_v4 = vld [vmem:[%s739_s2 + $0x18] sm:$0xff]  ;;  %vm255_vm0 = vcmask 1041408  }
  0x15   : > { %503 = vset.pattern.permute.xlu1 %v584_v0  ;;  %502 = vset.pattern.permute.xlu0 %v584_v0  ;;  %v215_v5 = vld [vmem:[%s739_s2 + $0x8] sm:$0xff]  ;;  %v439_v12 = vld [vmem:[%s738_s1] sm:$0xff]  ;;  %vm248_vm1 = vcmask 31744   ;;  %s331_s15 = sshll.u32 %s688_s28, 4  ;;  %s520_s9 = scalar_lea.hbm %s519_s8, 64  ;;  %s332_s15 = int_to_ptr.vmem [resolvable:$true] %s331_s15 }
  0x16   : > { %230 = vperm.xlu1 %503, %v216_v1   ;;  %220 = vperm.xlu0 %502, %v214_v2   ;;  %s438_s4 = sshll.u32 %s191_s30, 3  ;;  %v440_v13 = vld [vmem:[%s738_s1 + $0x8] sm:$0xff]  ;;  %p521_p12 = scmp.ne.s32.totalorder %s519_s8, %s520_s9 }
  0x17   : > { %s197_s7 = scalar_lea.vmem %s737_s0, %s438_s4  ;;  %p525_p1 = scmp.lt.s32.totalorder %s519_s8, %s740_s3 }
  0x18   : > { %v201_v3 = vld [vmem:[%s197_s7] sm:$0xff]  ;;  %s317_s7 = scalar_lea.sflag [#allocation3], %s186_s26  ;;  %p522_p13 = pnand %p521_p12, %p647_p4 }
  0x19   : > { %203 = vst [vmem:[#allocation1] ss:$2 sm:$0xff] %v201_v3  ;;  %p526_p2 = scmp.lt.s32.totalorder %s524_s18, %s520_s9 }
  0x1a   : > { %p523_p0 = pneg %p522_p13 }
  0x1b   : > { %p527_p3 = por %p526_p2, %p525_p1 }
  0x1d   : > { %p528_p5 = pnand %p527_p3, %p523_p0 }
  0x1e   : > { %235 = vperm.xlu1 %503, %v217_v4   ;;  %225 = vperm.xlu0 %502, %v215_v5  }
  0x20   : > { %v204_v6 = vld.sshfl [vmem:[#allocation1] sm:$0xff pattern:$0x75316420]  ;;  %v205_v7 = vld.sshfl [vmem:[#allocation1 + $0x8] sm:$0xff pattern:$0x75316420] }
  0x21   : > { %v208_v8 = vpack.c.bf16 %v204_v6, %v204_v6  ;;  %v209_v9 = vpack.c.bf16 %v205_v7, %v205_v7 }
  0x23   : > { %v257_v10 = vsel %vm255_vm0, %v208_v8, 0  ;;  %v260_v11 = vsel %vm255_vm0, %v209_v9, 0 }
  0x24   : > { %269 = vmatpush.bf16.msra.mxu0 %v257_v10  ;;  %442 = vmatpush.bf16.msra.mxu2 %v257_v10 }
  0x25   : > { %288 = vmatpush.bf16.msra.mxu1 %v260_v11  ;;  %443 = vmatpush.bf16.msra.mxu3 %v260_v11 }
  0x27   : > { %429 = vmatmul.msk.bf16.vlgmr.msra.gmra.mxu0 %vm248_vm1, %v439_v12  ;;  %430 = vmatmul.msk.bf16.vlgmr.msra.gmra.mxu2 %vm248_vm1, %v440_v13 }
  0x28   : > { %431 = vmatmul.msk.bf16.vlgmr.msra.gmra.mxu1 %vm248_vm1, %v439_v12  ;;  %432 = vmatmul.msk.bf16.vlgmr.msra.gmra.mxu3 %vm248_vm1, %v440_v13 }
  0x88   : > { %v221_v14 = vpop.permute.xlu0 %220  ;;  %v231_v20 = vpop.permute.xlu1 %230 }
  0x90   : > { %v226_v25 = vpop.permute.xlu0 %225  ;;  %v236_v35 = vpop.permute.xlu1 %235 }
  0xa4   : > { %v271_v15 = vpop.f32.mrf.mxu0 }
  0xa5   : > { %v272_v16 = vadd.f32 %v271_v15, %v221_v14  ;;  %v290_v17 = vpop.f32.mrf.mxu1 }
  0xa6   : > { %v291_v18 = vadd.f32 %v290_v17, %v221_v14 }
  0xa7   : > { %v300_v19 = vmax.f32 %v272_v16, 0.0 }
  0xa8   : > { %v301_v21 = vmax.f32 %v291_v18, 0.0 }
  0xa9   : > { %308 = vst [vmem:[%s688_s28] sm:$0xff] %v300_v19 }
  0xaa   : > { %309 = vst [vmem:[%s688_s28 + $0x8] sm:$0xff] %v301_v21  ;;  %v276_v22 = vpop.f32.mrf.mxu2 }
  0xab   : > { %v277_v23 = vadd.f32 %v276_v22, %v231_v20  ;;  %v295_v24 = vpop.f32.mrf.mxu3 }
  0xac   : > { %v296_v26 = vadd.f32 %v295_v24, %v231_v20  ;;  %v273_v27 = vpop.f32.mrf.mxu0 }
  0xad   : > { %v304_v28 = vmax.f32 %v277_v23, 0.0  ;;  %v274_v29 = vadd.f32 %v273_v27, %v226_v25  ;;  %v292_v30 = vpop.f32.mrf.mxu1 }
  0xae   : > { %v305_v31 = vmax.f32 %v296_v26, 0.0  ;;  %v293_v32 = vadd.f32 %v292_v30, %v226_v25 }
  0xaf   : > { %312 = vst [vmem:[%s688_s28 + $0x20] sm:$0xff] %v304_v28  ;;  %v302_v33 = vmax.f32 %v274_v29, 0.0 }
  0xb0   : > { %313 = vst [vmem:[%s688_s28 + $0x28] sm:$0xff] %v305_v31  ;;  %v303_v34 = vmax.f32 %v293_v32, 0.0 }
  0xb1   : > { %310 = vst [vmem:[%s688_s28 + $0x10] sm:$0xff] %v302_v33 }
  0xb2   : > { %311 = vst [vmem:[%s688_s28 + $0x18] sm:$0xff] %v303_v34  ;;  %v278_v36 = vpop.f32.mrf.mxu2 }
  0xb3   : > { %v279_v37 = vadd.f32 %v278_v36, %v236_v35  ;;  %v297_v38 = vpop.f32.mrf.mxu3 }
  0xb4   : > { %v298_v39 = vadd.f32 %v297_v38, %v236_v35 }
  0xb5   : > { %v306_v40 = vmax.f32 %v279_v37, 0.0 }
  0xb6   : > { %v307_v41 = vmax.f32 %v298_v39, 0.0 }
  0xb7   : > { %314 = vst [vmem:[%s688_s28 + $0x30] sm:$0xff] %v306_v40 }
  0xb8   : > { %315 = vst [vmem:[%s688_s28 + $0x38] sm:$0xff] %v307_v41 }
  0xb9   : > { %531 = shalt.err (!%p528_p5)
}
  0xba   : > { %s585_s23 = smov 256   ;;  %s586_s26 = smov 16  }
  0xbb   : > { %444 = dma.vmem_to_hbm [thread:$0]  (%p647_p4), %s332_s15, 1024, %s334_s6, %s317_s7, %s585_s23, %s585_s23, %s586_s26  }
  0xbc PF: > { %p450_p6 = scmp.ge.s32.totalorder %s582_s17, 2  ;;  %s348_s27 = sand.u32 1, %s562_s12  }
  0xbd   : > { %s349_s28 = scalar_lea.sflag [#allocation3], %s348_s27 }
  0xbe   : > { %p447_p7 = pnand %p450_p6, %p654_p8 }
  0xc0   : > { %p448_p9 = pneg %p447_p7 }
  0xc2   : > { %557 = dma.done.wait (%p448_p9), %s349_s28, 1024  }
  0xc3   : > { %559 = vsyncadd (%p448_p9), %s349_s28, 4294966272  ;;  %s16_s17 = sadd.s32 1, %s582_s17   ;;  %s743_s12 = smov %s566_s13 }
  0xc4   : > { %p13_p10 = scmp.ge.s32.totalorder %s16_s17, 4   ;;  %s744_s13 = smov %s570_s14 }
  0xc5   : > { %s745_s14 = smov %s660_s25  ;;  %s746_s15 = smov %s578_s16 }
  0xc6   : > { %s747_s16 = smov %s749_s20  ;;  %15 = sbr.rel (!%p13_p10) target bundleno = 4 (0x4), region = 67 }
  0xcb   :  { %355 = vsyncpa [#allocation3], 1 }
  0xcc   :  { %357 = vsyncpa [#allocation3 + $0x1], 1 }

</bundles_post_ra>
